<compile_context>
chip_gen: v5e
topology: v5e:2x2
jax: 0.10.0
libtpu: 0.0.40
codegen_flags: <defaults>
</compile_context>

<pallas_src>
import functools
import math

import jax
import jax.numpy as jnp
from jax.experimental import pallas as pl
from jax.experimental.pallas import tpu as pltpu

_LANE = 128
# Bytes per input per grid-step block (2 inputs x 2 buffers x 2 MiB = 8 MiB).
_MAX_BLOCK_BYTES = 2 * 1024 * 1024


def _dice_partial_kernel(preds_ref, targets_ref, inter_ref, psum_ref, tsum_ref,
                         *, n_valid, tile_rows, blocks_per_chunk,
                         covered_elems):
    """Grid = (batch, chunk, spatial_block).

    preds_ref / targets_ref : (1, tile_rows, 128) input blocks.
    inter/psum/tsum refs    : (1, 1, 1, 128) f32 lane-wise partial sums for
                              this (batch, chunk); same output block across
                              the innermost axis -> resident accumulator.
    """
    c = pl.program_id(1)
    s = pl.program_id(2)

    @pl.when(s == 0)
    def _():
        inter_ref[...] = jnp.zeros_like(inter_ref)
        psum_ref[...] = jnp.zeros_like(psum_ref)
        tsum_ref[...] = jnp.zeros_like(tsum_ref)

    block_id = c * blocks_per_chunk + s          # logical spatial block index

    def _accumulate(masked):
        x = preds_ref[0]                          # (tile_rows, 128)
        t = targets_ref[0]
        if x.dtype != jnp.float32:
            x = x.astype(jnp.float32)
        if t.dtype != jnp.float32:
            t = t.astype(jnp.float32)
        # sigmoid = 1 / (1 + exp(-x)); exp + approx reciprocal both run on the
        # EUP slot, keeping the VPU free on the bandwidth-bound path.
        sig = pl.reciprocal(1.0 + jnp.exp(-x), approx=True)
        if masked:
            row = jax.lax.broadcasted_iota(jnp.int32, x.shape, 0)
            lane = jax.lax.broadcasted_iota(jnp.int32, x.shape, 1)
            elem = (block_id * tile_rows + row) * _LANE + lane
            valid = elem < n_valid
            sig = jnp.where(valid, sig, 0.0)
            t = jnp.where(valid, t, 0.0)
        # Lane-wise accumulation: the row reduction is plain vreg adds plus a
        # tiny sublane tree; the 128-lane reduce happens once in the wrapper.
        inter_ref[0, 0] += jnp.sum(sig * t, axis=0, keepdims=True)
        psum_ref[0, 0] += jnp.sum(sig, axis=0, keepdims=True)
        tsum_ref[0, 0] += jnp.sum(t, axis=0, keepdims=True)

    if covered_elems == n_valid:
        # Every element of every block is valid -> no mask code at all.
        _accumulate(False)
    else:
        n_full_rows = n_valid // _LANE
        needs_mask = (block_id + 1) * tile_rows > n_full_rows

        @pl.when(needs_mask)
        def _():
            _accumulate(True)

        @pl.when(jnp.logical_not(needs_mask))
        def _():
            _accumulate(False)


def _round_up(x, m):
    return ((x + m - 1) // m) * m


def binary_dice_loss(preds, targets, smooth=1.0):
    """Pallas implementation of BinaryDiceLoss.forward."""
    B = preds.shape[0]
    S = math.prod(preds.shape[1:]) if preds.ndim > 1 else 1
    assert targets.shape[0] == B
    assert (math.prod(targets.shape[1:]) if targets.ndim > 1 else 1) == S

    p = preds.reshape(B, S)
    t = targets.reshape(B, S)

    # Lay the flattened spatial axis out as (rows, 128) so blocks fill full
    # (8,128) vregs.  The reshape is layout-preserving (free); only when S is
    # not a multiple of 128 do we pay a pad copy (pad values are irrelevant:
    # the in-kernel mask zeroes their contribution).
    S_128 = _round_up(S, _LANE)
    if S_128 != S:
        # TODO(synk): this jnp.pad materializes an HBM copy of both inputs;
        # only hit when the flattened spatial size is not a multiple of 128.
        p = jnp.pad(p, ((0, 0), (0, S_128 - S)))
        t = jnp.pad(t, ((0, 0), (0, S_128 - S)))
    R = S_128 // _LANE
    p = p.reshape(B, R, _LANE)
    t = t.reshape(B, R, _LANE)

    itemsize = max(p.dtype.itemsize, t.dtype.itemsize)
    max_rows = _MAX_BLOCK_BYTES // (_LANE * itemsize)   # multiple of 32
    # If the whole row axis fits, use it as one block (block == full array dim
    # is always a legal tiling); otherwise use the 2 MiB cap (multiple of 32,
    # so f32/bf16/int8 sublane packing is all satisfied).
    tile_rows = R if R <= max_rows else max_rows
    n_blocks = pl.cdiv(R, tile_rows)

    # Small-batch megacore split: with B == 1 the batch axis can't feed both
    # v7x TensorCores, so split the spatial blocks into 2 "parallel" chunks.
    n_chunks = 2 if (B == 1 and n_blocks >= 2) else 1
    blocks_per_chunk = pl.cdiv(n_blocks, n_chunks)
    covered_elems = n_chunks * blocks_per_chunk * tile_rows * _LANE

    if n_chunks * blocks_per_chunk == n_blocks:
        def in_index_map(b, c, s):
            return (b, c * blocks_per_chunk + s, 0)
    else:
        def in_index_map(b, c, s):
            # Clamp phantom trailing blocks onto the last real block; their
            # contribution is fully masked out in the kernel.
            return (b, jnp.minimum(c * blocks_per_chunk + s, n_blocks - 1), 0)

    in_spec = pl.BlockSpec((1, tile_rows, _LANE), in_index_map)
    part_shape = jax.ShapeDtypeStruct((B, n_chunks, 1, _LANE), jnp.float32)
    part_spec = pl.BlockSpec((1, 1, 1, _LANE), lambda b, c, s: (b, c, 0, 0))

    kernel = functools.partial(
        _dice_partial_kernel,
        n_valid=S,
        tile_rows=tile_rows,
        blocks_per_chunk=blocks_per_chunk,
        covered_elems=covered_elems,
    )

    inter, psum, tsum = pl.pallas_call(
        kernel,
        out_shape=(part_shape, part_shape, part_shape),
        grid_spec=pltpu.PrefetchScalarGridSpec(
            num_scalar_prefetch=0,
            grid=(B, n_chunks, blocks_per_chunk),
            in_specs=[in_spec, in_spec],
            out_specs=(part_spec, part_spec, part_spec),
        ),
        compiler_params=pltpu.CompilerParams(
            # batch & chunk axes own distinct output blocks -> megacore
            # parallel; the spatial-block axis carries the accumulators.
            dimension_semantics=("parallel", "parallel", "arbitrary"),
        ),
    )(p, t)

    inter = jnp.sum(inter, axis=(1, 2, 3))     # (B,)
    psum = jnp.sum(psum, axis=(1, 2, 3))
    tsum = jnp.sum(tsum, axis=(1, 2, 3))
    dice = (2.0 * inter + float(smooth)) / (psum + tsum + float(smooth))
    return 1.0 - jnp.mean(dice)


def binary_dice_loss_ref(preds, targets, smooth=1.0):
    """Pure-JAX reference mirroring the PyTorch forward."""
    B = preds.shape[0]
    p = jax.nn.sigmoid(preds.astype(jnp.float32)).reshape(B, -1)
    t = targets.astype(jnp.float32).reshape(B, -1)
    inter = jnp.sum(p * t, axis=-1)
    dice = (2.0 * inter + smooth) / (jnp.sum(p, -1) + jnp.sum(t, -1) + smooth)
    return 1.0 - jnp.mean(dice)


if __name__ == "__main__":
    key = jax.random.PRNGKey(0)

    shapes = [
        (2, 4, 16, 16),      # primary small example: S % 128 == 0, one block
        (1, 3, 17, 23),      # ragged tail: pad-to-128 + in-kernel mask
        (1, 4, 520, 520),    # multi-block + small-batch chunk split + clamp
    ]
    loss = None
    for i, shp in enumerate(shapes):
        k1, k2 = jax.random.split(jax.random.fold_in(key, i))
        preds = jax.random.normal(k1, shp, dtype=jnp.float32)
        targets = jax.random.bernoulli(k2, 0.5, shp).astype(jnp.float32)

        loss = binary_dice_loss(preds, targets, smooth=1.0)
        jax.block_until_ready(loss)

        ref = binary_dice_loss_ref(preds, targets, smooth=1.0)
        # approx reciprocal in the kernel -> allow ~1e-3 deviation.
        assert jnp.allclose(loss, ref, atol=1e-3, rtol=1e-3), (shp, loss, ref)

    print("KERNEL_OK")
</pallas_src>

<mosaic_0001>
module attributes {stable_mosaic.version = 11 : i64} {
  func.func @_dice_partial_kernel(%arg0: i32, %arg1: i32, %arg2: i32, %arg3: memref<1x8x128xf32, #tpu.memory_space<vmem>>, %arg4: memref<1x8x128xf32, #tpu.memory_space<vmem>>, %arg5: memref<1x1x1x128xf32, #tpu.memory_space<vmem>>, %arg6: memref<1x1x1x128xf32, #tpu.memory_space<vmem>>, %arg7: memref<1x1x1x128xf32, #tpu.memory_space<vmem>>) attributes {dimension_semantics = [#tpu.dimension_semantics<parallel>, #tpu.dimension_semantics<parallel>, #tpu.dimension_semantics<arbitrary>], iteration_bounds = array<i64: 2, 1, 1>, scalar_prefetch = 0 : i64, scratch_operands = 0 : i64, tpu.core_type = #tpu.core_type<tc>, window_params = [{transform_indices = @transform_0, window_bounds = array<i64: 1, 8, 128>}, {transform_indices = @transform_1, window_bounds = array<i64: 1, 8, 128>}, {transform_indices = @transform_2, window_bounds = array<i64: 1, 1, 1, 128>}, {transform_indices = @transform_3, window_bounds = array<i64: 1, 1, 1, 128>}, {transform_indices = @transform_4, window_bounds = array<i64: 1, 1, 1, 128>}]} {
    %c0_i32 = arith.constant 0 : i32
    %0 = arith.cmpi eq, %arg2, %c0_i32 : i32
    %1 = arith.extui %0 : i1 to i32
    %c0_i32_0 = arith.constant 0 : i32
    %2 = arith.cmpi ne, %1, %c0_i32_0 : i32
    scf.if %2 {
      %cst_34 = arith.constant 0.000000e+00 : f32
      %38 = vector.broadcast %cst_34 : f32 to vector<1x1x1x128xf32>
      %c0_35 = arith.constant 0 : index
      %c0_36 = arith.constant 0 : index
      %c0_37 = arith.constant 0 : index
      %c0_38 = arith.constant 0 : index
      %39 = vector.load %arg5[%c0_35, %c0_36, %c0_37, %c0_38] : memref<1x1x1x128xf32, #tpu.memory_space<vmem>>, vector<1x1x1x128xf32>
      tpu.vector_store %arg5[%c0_35, %c0_36, %c0_37, %c0_38], %38 {strides = array<i32>} : memref<1x1x1x128xf32, #tpu.memory_space<vmem>>, vector<1x1x1x128xf32>,
      %cst_39 = arith.constant 0.000000e+00 : f32
      %40 = vector.broadcast %cst_39 : f32 to vector<1x1x1x128xf32>
      %c0_40 = arith.constant 0 : index
      %c0_41 = arith.constant 0 : index
      %c0_42 = arith.constant 0 : index
      %c0_43 = arith.constant 0 : index
      %41 = vector.load %arg6[%c0_40, %c0_41, %c0_42, %c0_43] : memref<1x1x1x128xf32, #tpu.memory_space<vmem>>, vector<1x1x1x128xf32>
      tpu.vector_store %arg6[%c0_40, %c0_41, %c0_42, %c0_43], %40 {strides = array<i32>} : memref<1x1x1x128xf32, #tpu.memory_space<vmem>>, vector<1x1x1x128xf32>,
      %cst_44 = arith.constant 0.000000e+00 : f32
      %42 = vector.broadcast %cst_44 : f32 to vector<1x1x1x128xf32>
      %c0_45 = arith.constant 0 : index
      %c0_46 = arith.constant 0 : index
      %c0_47 = arith.constant 0 : index
      %c0_48 = arith.constant 0 : index
      %43 = vector.load %arg7[%c0_45, %c0_46, %c0_47, %c0_48] : memref<1x1x1x128xf32, #tpu.memory_space<vmem>>, vector<1x1x1x128xf32>
      tpu.vector_store %arg7[%c0_45, %c0_46, %c0_47, %c0_48], %42 {strides = array<i32>} : memref<1x1x1x128xf32, #tpu.memory_space<vmem>>, vector<1x1x1x128xf32>,
    } else {
    }
    %c0 = arith.constant 0 : index
    %c0_1 = arith.constant 0 : index
    %c0_2 = arith.constant 0 : index
    %3 = vector.load %arg3[%c0, %c0_1, %c0_2] : memref<1x8x128xf32, #tpu.memory_space<vmem>>, vector<1x8x128xf32>
    %4 = vector.shape_cast %3 : vector<1x8x128xf32> to vector<8x128xf32>
    %c0_3 = arith.constant 0 : index
    %c0_4 = arith.constant 0 : index
    %c0_5 = arith.constant 0 : index
    %5 = vector.load %arg4[%c0_3, %c0_4, %c0_5] : memref<1x8x128xf32, #tpu.memory_space<vmem>>, vector<1x8x128xf32>
    %6 = vector.shape_cast %5 : vector<1x8x128xf32> to vector<8x128xf32>
    %cst = arith.constant 0.000000e+00 : f32
    %7 = vector.broadcast %cst : f32 to vector<8x128xf32>
    %8 = arith.subf %7, %4 : vector<8x128xf32>
    %9 = math.exp %8 : vector<8x128xf32>
    %cst_6 = arith.constant 1.000000e+00 : f32
    %10 = vector.broadcast %cst_6 : f32 to vector<8x128xf32>
    %11 = arith.addf %10, %9 : vector<8x128xf32>
    %12 = tpu.reciprocal %11 {approx = true} : vector<8x128xf32> -> vector<8x128xf32>
    %c0_7 = arith.constant 0 : index
    %c0_8 = arith.constant 0 : index
    %c0_9 = arith.constant 0 : index
    %c0_10 = arith.constant 0 : index
    %13 = vector.load %arg5[%c0_7, %c0_8, %c0_9, %c0_10] : memref<1x1x1x128xf32, #tpu.memory_space<vmem>>, vector<1x1x1x128xf32>
    %14 = vector.shape_cast %13 : vector<1x1x1x128xf32> to vector<1x128xf32>
    %15 = arith.mulf %12, %6 : vector<8x128xf32>
    %cst_11 = arith.constant dense<0.000000e+00> : vector<128xf32>
    %16 = vector.multi_reduction <add>, %15, %cst_11 [0] : vector<8x128xf32> to vector<128xf32>
    %17 = vector.shape_cast %16 : vector<128xf32> to vector<1x128xf32>
    %18 = arith.addf %14, %17 : vector<1x128xf32>
    %c0_12 = arith.constant 0 : index
    %c0_13 = arith.constant 0 : index
    %c0_14 = arith.constant 0 : index
    %c0_15 = arith.constant 0 : index
    %19 = vector.load %arg5[%c0_12, %c0_13, %c0_14, %c0_15] : memref<1x1x1x128xf32, #tpu.memory_space<vmem>>, vector<1x1x1x128xf32>
    %20 = vector.shape_cast %19 : vector<1x1x1x128xf32> to vector<1x128xf32>
    %21 = vector.shape_cast %18 : vector<1x128xf32> to vector<1x1x1x128xf32>
    tpu.vector_store %arg5[%c0_12, %c0_13, %c0_14, %c0_15], %21 {strides = array<i32>} : memref<1x1x1x128xf32, #tpu.memory_space<vmem>>, vector<1x1x1x128xf32>,
    %c0_16 = arith.constant 0 : index
    %c0_17 = arith.constant 0 : index
    %c0_18 = arith.constant 0 : index
    %c0_19 = arith.constant 0 : index
    %22 = vector.load %arg6[%c0_16, %c0_17, %c0_18, %c0_19] : memref<1x1x1x128xf32, #tpu.memory_space<vmem>>, vector<1x1x1x128xf32>
    %23 = vector.shape_cast %22 : vector<1x1x1x128xf32> to vector<1x128xf32>
    %cst_20 = arith.constant dense<0.000000e+00> : vector<128xf32>
    %24 = vector.multi_reduction <add>, %12, %cst_20 [0] : vector<8x128xf32> to vector<128xf32>
    %25 = vector.shape_cast %24 : vector<128xf32> to vector<1x128xf32>
    %26 = arith.addf %23, %25 : vector<1x128xf32>
    %c0_21 = arith.constant 0 : index
    %c0_22 = arith.constant 0 : index
    %c0_23 = arith.constant 0 : index
    %c0_24 = arith.constant 0 : index
    %27 = vector.load %arg6[%c0_21, %c0_22, %c0_23, %c0_24] : memref<1x1x1x128xf32, #tpu.memory_space<vmem>>, vector<1x1x1x128xf32>
    %28 = vector.shape_cast %27 : vector<1x1x1x128xf32> to vector<1x128xf32>
    %29 = vector.shape_cast %26 : vector<1x128xf32> to vector<1x1x1x128xf32>
    tpu.vector_store %arg6[%c0_21, %c0_22, %c0_23, %c0_24], %29 {strides = array<i32>} : memref<1x1x1x128xf32, #tpu.memory_space<vmem>>, vector<1x1x1x128xf32>,
    %c0_25 = arith.constant 0 : index
    %c0_26 = arith.constant 0 : index
    %c0_27 = arith.constant 0 : index
    %c0_28 = arith.constant 0 : index
    %30 = vector.load %arg7[%c0_25, %c0_26, %c0_27, %c0_28] : memref<1x1x1x128xf32, #tpu.memory_space<vmem>>, vector<1x1x1x128xf32>
    %31 = vector.shape_cast %30 : vector<1x1x1x128xf32> to vector<1x128xf32>
    %cst_29 = arith.constant dense<0.000000e+00> : vector<128xf32>
    %32 = vector.multi_reduction <add>, %6, %cst_29 [0] : vector<8x128xf32> to vector<128xf32>
    %33 = vector.shape_cast %32 : vector<128xf32> to vector<1x128xf32>
    %34 = arith.addf %31, %33 : vector<1x128xf32>
    %c0_30 = arith.constant 0 : index
    %c0_31 = arith.constant 0 : index
    %c0_32 = arith.constant 0 : index
    %c0_33 = arith.constant 0 : index
    %35 = vector.load %arg7[%c0_30, %c0_31, %c0_32, %c0_33] : memref<1x1x1x128xf32, #tpu.memory_space<vmem>>, vector<1x1x1x128xf32>
    %36 = vector.shape_cast %35 : vector<1x1x1x128xf32> to vector<1x128xf32>
    %37 = vector.shape_cast %34 : vector<1x128xf32> to vector<1x1x1x128xf32>
    tpu.vector_store %arg7[%c0_30, %c0_31, %c0_32, %c0_33], %37 {strides = array<i32>} : memref<1x1x1x128xf32, #tpu.memory_space<vmem>>, vector<1x1x1x128xf32>,
    return
  }
  func.func @transform_0(%arg0: i32, %arg1: i32, %arg2: i32) -> (i32, i32, i32) {
    %c1_i32 = arith.constant 1 : i32
    %0 = arith.muli %arg1, %c1_i32 : i32
    %1 = arith.addi %0, %arg2 : i32
    %c0_i32 = arith.constant 0 : i32
    %c0_i32_0 = arith.constant 0 : i32
    return %arg0, %1, %c0_i32 : i32, i32, i32
  }
  func.func @transform_1(%arg0: i32, %arg1: i32, %arg2: i32) -> (i32, i32, i32) {
    %c1_i32 = arith.constant 1 : i32
    %0 = arith.muli %arg1, %c1_i32 : i32
    %1 = arith.addi %0, %arg2 : i32
    %c0_i32 = arith.constant 0 : i32
    %c0_i32_0 = arith.constant 0 : i32
    return %arg0, %1, %c0_i32 : i32, i32, i32
  }
  func.func @transform_2(%arg0: i32, %arg1: i32, %arg2: i32) -> (i32, i32, i32, i32) {
    %c0_i32 = arith.constant 0 : i32
    %c0_i32_0 = arith.constant 0 : i32
    %c0_i32_1 = arith.constant 0 : i32
    return %arg0, %arg1, %c0_i32, %c0_i32_0 : i32, i32, i32, i32
  }
  func.func @transform_3(%arg0: i32, %arg1: i32, %arg2: i32) -> (i32, i32, i32, i32) {
    %c0_i32 = arith.constant 0 : i32
    %c0_i32_0 = arith.constant 0 : i32
    %c0_i32_1 = arith.constant 0 : i32
    return %arg0, %arg1, %c0_i32, %c0_i32_0 : i32, i32, i32, i32
  }
  func.func @transform_4(%arg0: i32, %arg1: i32, %arg2: i32) -> (i32, i32, i32, i32) {
    %c0_i32 = arith.constant 0 : i32
    %c0_i32_0 = arith.constant 0 : i32
    %c0_i32_1 = arith.constant 0 : i32
    return %arg0, %arg1, %c0_i32, %c0_i32_0 : i32, i32, i32, i32
  }
}

</mosaic_0001>

<bundles_post_ra>
// kernel: tpu_custom_call.1
= control target key start
LH: loop header
LB: loop body
LE: loop exit
PB: predicated region body
PF: predicated region fallthrough
CT: control target
= control target key end

     0   :  { %10 = vsyncpa [#allocation3], 0  ;;  %s1098_s0 = inlined_call_operand.hbm [shape: f32[2,8,128], index: 0, kind: input, shape index: {}]   ;;  %s1099_s1 = inlined_call_operand.hbm [shape: f32[2,8,128], index: 1, kind: input, shape index: {}]   ;;  %s1100_s2 = inlined_call_operand.hbm [shape: f32[2,1,1,128], index: 2, kind: output, shape index: {0}]   ;;  %s1101_s3 = inlined_call_operand.hbm [shape: f32[2,1,1,128], index: 3, kind: output, shape index: {1}]   ;;  %s1102_s4 = inlined_call_operand.hbm [shape: f32[2,1,1,128], index: 4, kind: output, shape index: {2}]  }
   0x1   :  { %12 = vsyncpa [#allocation3 + $0x1], 0 }
   0x2   :  { %13 = vsyncpa [#allocation6], 0 }
   0x3   :  { %15 = vsyncpa [#allocation6 + $0x1], 0 }
   0x4   :  { %16 = vsyncpa [#allocation4], 0 }
   0x5   :  { %18 = vsyncpa [#allocation4 + $0x1], 0 }
   0x6   :  { %19 = vsyncpa [#allocation9], 0 }
   0x7   :  { %21 = vsyncpa [#allocation9 + $0x1], 0  ;;  %s889_s15 = smov 0   ;;  %s891_s16 = smov 0  }
   0x8   :  { %s893_s17 = smov 0   ;;  %s895_s18 = smov 0  }
   0x9   :  { %s897_s19 = smov 0   ;;  %s899_s20 = smov 0  }
   0xa LB: > { %1106 = sst [smem:[#allocation15_spill]] %s857_s19  ;;  %s920_s21 = sadd.s32 4294967295, %s861_s20   ;;  %s861_s20 = sphi %s899_s20, %s27_s20   ;;  %s857_s19 = sphi %s897_s19, %s1114_s19   ;;  %s853_s18 = sphi %s895_s18, %s1113_s18   ;;  %s849_s17 = sphi %s893_s17, %s1117_s17   ;;  %s845_s16 = sphi %s891_s16, %s1116_s16   ;;  %s841_s15 = sphi %s889_s15, %s1115_s15  }
   0xb   : > { %s1103_s22 = sadd.s32 4294967294, %s861_s20   ;;  %s46_s23 = sadd.s32 1, %s857_s19 }
   0xc   : > { %s57_s24 = sadd.s32 1, %s849_s17  ;;  %p48_p0 = scmp.ge.s32.totalorder %s46_s23, 2 }
   0xd   : > { %p64_p1 = scmp.ne.s32.totalorder %s849_s17, %s845_s16  ;;  %p65_p2 = scmp.eq.s32.totalorder %s861_s20, 0 }
   0xe   : > { %p70_p3 = scmp.ne.s32.totalorder %s845_s16, %s841_s15  ;;  %s1119_s23 = smov (%p48_p0, %s46_s23), 0 }
   0xf   : > { %1107 = sst [smem:[#allocation16_spill]] %s1119_s23  ;;  %p932_p4 = por %p65_p2, %p64_p1 }
  0x10   : > { %p71_p5 = scmp.eq.s32.totalorder %s920_s21, 0  ;;  %s52_s26 = ssub.s32 %s857_s19, %s1119_s23 }
  0x11   : > { %p126_p6 = scmp.eq.s32.totalorder %s920_s21, 1  ;;  %p55_p7 = scmp.eq.s32.totalorder %s52_s26, 0 }
  0x12   : > { %p940_p8 = por %p71_p5, %p70_p3  ;;  %p132_p10 = scmp.eq.s32.totalorder %s1103_s22, 1 }
  0x13   : > { %p944_p9 = por %p126_p6, %p64_p1  ;;  %p563_p12 = scmp.ge.s32.totalorder %s861_s20, 2 }
  0x14   : > { %s951_s29 = scalar_select %p55_p7, %s849_s17, %s57_s24  }
  0x15   : > { %p953_p11 = por %p132_p10, %p70_p3  ;;  %p600_p13 = scmp.lt.s32.totalorder %s861_s20, 2 }
  0x16   : > { %s208_s5 = sand.u32 1, %s849_s17   ;;  %s565_s7 = sshll.u32 %s857_s19, 3 }
  0x17   : > { %s564_s6 = sshll.u32 %s208_s5, 3  ;;  %s218_s10 = scalar_lea.hbm %s1098_s0, %s565_s7 }
  0x18   : > { %s212_s11 = scalar_lea.vmem [#allocation2], %s564_s6  ;;  %s220_s13 = sshll.u32 %s218_s10, 4  ;;  %s221_s13 = int_to_ptr.hbm [resolvable:$true] %s220_s13 }
  0x19   : > { %s222_s12 = sshll.u32 %s212_s11, 4  ;;  %p584_p0 = pnand %p600_p13, %p932_p4  ;;  %s223_s12 = int_to_ptr.vmem [resolvable:$true] %s222_s12 }
  0x1a   : > { %p568_p1 = scmp.ge.s32.totalorder %s861_s20, 1  ;;  %p248_p2 = scmp.lt.s32.totalorder %s861_s20, 3 }
  0x1b   : > { %s209_s14 = scalar_lea.sflag [#allocation3], %s208_s5  ;;  %s239_s22 = scalar_lea.hbm %s1099_s1, %s565_s7 }
  0x1c   : > { %586 = dma.hbm_to_vmem [thread:$0]  (!%p584_p0), %s221_s13, 128, %s223_s12, %s209_s14  }
  0x1d   : > { %p249_p3 = pnand %p568_p1, %p248_p2  ;;  %s233_s23 = scalar_lea.vmem [#allocation5], %s564_s6 }
  0x1e   : > { %s243_s19 = sshll.u32 %s233_s23, 4  ;;  %s241_s8 = sshll.u32 %s239_s22, 4  ;;  %s244_s19 = int_to_ptr.vmem [resolvable:$true] %s243_s19  ;;  %s242_s8 = int_to_ptr.hbm [resolvable:$true] %s241_s8 }
  0x1f   : > { %s230_s9 = scalar_lea.sflag [#allocation6], %s208_s5  ;;  %252 = sbr.rel (%p249_p3) target bundleno = 101 (0x65), region = 28 }
  0x20   : > { %589 = dma.hbm_to_vmem [thread:$0]  (!%p584_p0), %s242_s8, 128, %s244_s19, %s230_s9  }
  0x21   : > { %s972_s25 = sand.u32 (!%p249_p3), 1, %s845_s16  }
  0x22   : > { %s569_s10 = sshll.u32 (!%p249_p3), %s972_s25, 3  ;;  %s255_s11 = scalar_lea.sflag (!%p249_p3), [#allocation3], %s972_s25 }
  0x23   : > { %s258_s12 = scalar_lea.vmem (!%p249_p3), [#allocation2], %s569_s10 }
  0x24   : > { %824 = dma.done.wait (%p940_p8), %s255_s11, 128  }
  0x25   : > { %826 = vsyncadd (%p940_p8), %s255_s11, 4294967168  ;;  %s265_s22 = scalar_lea.sflag [#allocation6], %s972_s25  ;;  %s268_s23 = scalar_lea.vmem [#allocation5], %s569_s10 }
  0x26   : > { %828 = dma.done.wait (%p940_p8), %s265_s22, 128  }
  0x27   : > { %830 = vsyncadd (%p940_p8), %s265_s22, 4294967168  ;;  %s986_s19 = scalar_lea.vmem [#allocation8], %s972_s25  ;;  %v863_v0 = vmov 0.0   ;;  %s990_s5 = scalar_lea.vmem [#allocation7], %s972_s25  ;;  %v315_v1 = vld [vmem:[%s258_s12] sm:$0xff]  ;;  %v316_v2 = vld [vmem:[%s268_s23] sm:$0xff] }
  0x28   : > { %313 = vst [vmem:[%s986_s19] sm:$0x1] %v863_v0  ;;  %s994_s6 = scalar_lea.vmem [#allocation10], %s972_s25  ;;  %v317_v3 = vsub.f32 0.0, %v315_v1  ;;  %v342_v4 = vrot.slane %v316_v2, 4  ;;  %s354_s27 = sand.u32 1, %s920_s21  }
  0x29   : > { %312 = vst [vmem:[%s990_s5] sm:$0x1] %v863_v0  ;;  %s382_s14 = scalar_lea.hbm %s1101_s3, %s853_s18  ;;  %s398_s24 = sshll.u32 %s994_s6, 4  ;;  %s1017_s24 = int_to_ptr.vmem [resolvable:$true] %s398_s24 }
  0x2a   : > { %314 = vst [vmem:[%s994_s6] sm:$0x1] %v863_v0  ;;  %v318_v5 = vmul.f32 1.442695, %v317_v3  ;;  %v343_v6 = vadd.f32 %v342_v4, %v316_v2  ;;  %s396_s9 = scalar_lea.hbm %s1102_s4, %s853_s18  ;;  %s368_s12 = scalar_lea.hbm %s1100_s2, %s853_s18 }
  0x2b   : > { %s384_s21 = sshll.u32 %s986_s19, 4  ;;  %s1015_s22 = sshll.u32 %s382_s14, 4  ;;  %s385_s21 = int_to_ptr.vmem [resolvable:$true] %s384_s21  ;;  %s387_s22 = int_to_ptr.hbm [resolvable:$true] %s1015_s22 }
  0x2c   : > { %651 = vpow2.f32 %v318_v5  ;;  %v344_v7 = vrot.slane %v343_v6, 2  ;;  %s1019_s23 = sshll.u32 %s396_s9, 4  ;;  %s1023_s7 = sshll.u32 %s368_s12, 4  ;;  %s401_s23 = int_to_ptr.hbm [resolvable:$true] %s1019_s23  ;;  %s373_s7 = int_to_ptr.hbm [resolvable:$true] %s1023_s7 }
  0x2d   : > { %s355_s18 = scalar_lea.sflag [#allocation9], %s354_s27  ;;  %s729_s13 = sshra.s32 %s387_s22, 4  ;;  %s730_s13 = int_to_ptr.hbm [resolvable:$true] %s729_s13 }
  0x2e   : > { %v345_v8 = vadd.f32 %v344_v7, %v343_v6  ;;  %s731_s14 = scalar_lea.hbm %s730_s13, 1  ;;  %s735_s9 = scalar_lea.hbm %s1101_s3, 2 }
  0x2f   : > { %v332_v26 = vld [vmem:[%s986_s19] sm:$0x1]  ;;  %p732_p4 = scmp.ne.s32.totalorder %s730_s13, %s731_s14  ;;  %p736_p7 = scmp.lt.s32.totalorder %s730_s13, %s1101_s3 }
  0x30   : > { %v346_v9 = vrot.slane %v345_v8, 1  ;;  %v322_v29 = vld [vmem:[%s990_s5] sm:$0x1]  ;;  %p737_p8 = scmp.lt.s32.totalorder %s735_s9, %s731_s14 }
  0x31   : > { %v341_v10 = vld [vmem:[%s994_s6] sm:$0x1]  ;;  %p733_p5 = pnand %p732_p4, %p944_p9 }
  0x32   : > { %v652_v11 = vpop.eup %651  ;;  %v347_v12 = vadd.f32 %v346_v9, %v345_v8  ;;  %p738_p10 = por %p737_p8, %p736_p7 }
  0x33   : > { %v320_v13 = vadd.f32 1.0, %v652_v11  ;;  %p734_p6 = pneg %p733_p5 }
  0x34   : > { %v348_v14 = vadd.f32 %v347_v12, %v341_v10 }
  0x35   : > { %653 = vrcp.f32 %v320_v13  ;;  %p739_p13 = pnand %p738_p10, %p734_p6 }
  0x36   : > { %349 = vst [vmem:[%s994_s6] sm:$0x1] %v348_v14  ;;  %s370_s6 = sshll.u32 %s990_s5, 4  ;;  %s1028_s6 = int_to_ptr.vmem [resolvable:$true] %s370_s6 }
  0x3b   : > { %v654_v15 = vpop.eup %653 }
  0x3c   : > { %v333_v16 = vrot.slane %v654_v15, 4  ;;  %v323_v17 = vmul.f32 %v654_v15, %v316_v2 }
  0x3e   : > { %v334_v18 = vadd.f32 %v654_v15, %v333_v16  ;;  %v324_v19 = vrot.slane %v323_v17, 4 }
  0x40   : > { %v335_v20 = vrot.slane %v334_v18, 2  ;;  %v325_v21 = vadd.f32 %v324_v19, %v323_v17 }
  0x42   : > { %v336_v22 = vadd.f32 %v335_v20, %v334_v18  ;;  %v326_v23 = vrot.slane %v325_v21, 2 }
  0x44   : > { %v337_v24 = vrot.slane %v336_v22, 1  ;;  %v327_v25 = vadd.f32 %v326_v23, %v325_v21 }
  0x46   : > { %v338_v27 = vadd.f32 %v337_v24, %v336_v22  ;;  %v328_v28 = vrot.slane %v327_v25, 1 }
  0x48   : > { %v339_v30 = vadd.f32 %v338_v27, %v332_v26  ;;  %v329_v31 = vadd.f32 %v328_v28, %v327_v25 }
  0x4a   : > { %340 = vst [vmem:[%s986_s19] sm:$0x1] %v339_v30  ;;  %v330_v32 = vadd.f32 %v329_v31, %v322_v29 }
  0x4b   : > { %742 = shalt.err (!%p739_p13)
}
  0x4c   : > { %578 = dma.vmem_to_hbm [thread:$0]  (%p944_p9), %s385_s21, 16, %s387_s22, %s355_s18   ;;  %331 = vst [vmem:[%s990_s5] sm:$0x1] %v330_v32 }
  0x4d   : > { %s757_s19 = sshra.s32 %s401_s23, 4  ;;  %s763_s14 = scalar_lea.hbm %s1102_s4, 2  ;;  %s758_s19 = int_to_ptr.hbm [resolvable:$true] %s757_s19 }
  0x4e   : > { %s759_s27 = scalar_lea.hbm %s758_s19, 1  ;;  %p764_p3 = scmp.lt.s32.totalorder %s758_s19, %s1102_s4 }
  0x4f   : > { %p760_p0 = scmp.ne.s32.totalorder %s758_s19, %s759_s27  ;;  %p765_p4 = scmp.lt.s32.totalorder %s763_s14, %s759_s27 }
  0x51   : > { %p761_p1 = pnand %p760_p0, %p944_p9  ;;  %p766_p5 = por %p765_p4, %p764_p3 }
  0x53   : > { %p762_p2 = pneg %p761_p1 }
  0x55   : > { %p767_p6 = pnand %p766_p5, %p762_p2 }
  0x57   : > { %770 = shalt.err (!%p767_p6)
}
  0x58   : > { %579 = dma.vmem_to_hbm [thread:$0]  (%p944_p9), %s1017_s24, 16, %s401_s23, %s355_s18  }
  0x59   : > { %s351_s5 = scalar_lea.sflag [#allocation4], %s972_s25  ;;  %s785_s21 = sshra.s32 %s373_s7, 4  ;;  %s786_s21 = int_to_ptr.hbm [resolvable:$true] %s785_s21 }
  0x5a   : > { %s787_s22 = scalar_lea.hbm %s786_s21, 1  ;;  %s791_s11 = scalar_lea.hbm %s1100_s2, 2 }
  0x5b   : > { %p788_p7 = scmp.ne.s32.totalorder %s786_s21, %s787_s22  ;;  %p792_p13 = scmp.lt.s32.totalorder %s786_s21, %s1100_s2 }
  0x5c   : > { %p793_p0 = scmp.lt.s32.totalorder %s791_s11, %s787_s22 }
  0x5d   : > { %p789_p8 = pnand %p788_p7, %p944_p9 }
  0x5e   : > { %p794_p1 = por %p793_p0, %p792_p13 }
  0x5f   : > { %p790_p10 = pneg %p789_p8 }
  0x61   : > { %p795_p2 = pnand %p794_p1, %p790_p10 }
  0x63   : > { %798 = shalt.err (!%p795_p2)
}
  0x64   : > { %577 = dma.vmem_to_hbm [thread:$0]  (%p944_p9), %s1028_s6, 16, %s373_s7, %s351_s5  }
  0x65 PF: > { %s412_s25 = sand.u32 1, %s841_s15   ;;  %p591_p3 = pnand %p563_p12, %p953_p11 }
  0x66   : > { %s413_s24 = scalar_lea.sflag [#allocation4], %s412_s25 }
  0x67   : > { %p592_p4 = pneg %p591_p3 }
  0x69   : > { %832 = dma.done.wait (%p592_p4), %s413_s24, 16  }
  0x6a   : > { %834 = vsyncadd (%p592_p4), %s413_s24, 4294967280  ;;  %s1112_s23 = sadd.s32 4294967294, %s861_s20  }
  0x6b   : > { %s421_s18 = sand.u32 1, %s1112_s23  }
  0x6c   : > { %s422_s28 = scalar_lea.sflag [#allocation9], %s421_s18 }
  0x6d   : > { %836 = dma.done.wait (%p592_p4), %s422_s28, 32  }
  0x6e   : > { %838 = vsyncadd (%p592_p4), %s422_s28, 4294967264  ;;  %s27_s20 = sadd.s32 1, %s861_s20   ;;  %s1113_s18 = sld [smem:[#allocation15_spill]] }
  0x6f   : > { %p24_p9 = scmp.ge.s32.totalorder %s27_s20, 4   ;;  %s1114_s19 = sld [smem:[#allocation16_spill]] }
  0x70   : > { %s1115_s15 = smov %s845_s16  ;;  %s1116_s16 = smov %s849_s17 }
  0x71   : > { %s1117_s17 = smov %s951_s29  ;;  %26 = sbr.rel (!%p24_p9) target bundleno = 10 (0xa), region = 122 }
  0x76   :  { %436 = vsyncpa [#allocation3], 1 }
  0x77   :  { %438 = vsyncpa [#allocation3 + $0x1], 1 }
  0x78   :  { %439 = vsyncpa [#allocation6], 1 }
  0x79   :  { %441 = vsyncpa [#allocation6 + $0x1], 1 }
  0x7a   :  { %442 = vsyncpa [#allocation4], 1 }
  0x7b   :  { %444 = vsyncpa [#allocation4 + $0x1], 1 }
  0x7c   :  { %445 = vsyncpa [#allocation9], 1 }
  0x7d   :  { %447 = vsyncpa [#allocation9 + $0x1], 1 }

</bundles_post_ra>
